<compile_context>
chip_gen: v5e
topology: v5e:2x2
jax: 0.10.0
libtpu: 0.0.40
codegen_flags: <defaults>
</compile_context>

<pallas_src>
import numpy as np
import jax
import jax.numpy as jnp
from jax import lax
from jax.experimental import pallas as pl
from jax.experimental.pallas import tpu as pltpu

NEG = -1e30  # finite stand-in for -inf (avoids inf/nan in exp/log chains)
NB = 8       # batch rows per grid step (fills the 8 sublanes of a vreg)


def _forward_sum_kernel(out_lens_sref, attn_ref, sel_ref, k_ref, q_ref,
                        out_ref, e_ref):
    g = pl.program_id(0)
    Tq, nb, C = attn_ref.shape
    S_pad = e_ref.shape[2]

    # ---- block-max mel length from SMEM scalars (loop bound) ----
    base = g * nb
    qmax = out_lens_sref[base]
    for i in range(1, nb):
        qmax = jnp.maximum(qmax, out_lens_sref[base + i])

    k2 = k_ref[...]                       # (nb, 1) int32  : text lengths
    q2 = q_ref[...]                       # (nb, 1) int32  : mel lengths
    k3 = k2.reshape(1, nb, 1)

    # ---- per-row masked log_softmax over classes 0..k (blank = class 0) ----
    lp_raw = attn_ref[...]                                        # (Tq, nb, C)
    c_idx = lax.broadcasted_iota(jnp.int32, (Tq, nb, C), 2)
    x = jnp.where(c_idx <= k3, lp_raw, NEG)
    mx = jnp.max(x, axis=2, keepdims=True)
    lse = mx + jnp.log(jnp.sum(jnp.exp(x - mx), axis=2, keepdims=True))
    lp = x - lse                                                  # (Tq, nb, C)

    # ---- emissions for extended CTC states; sel is a resident constant ----
    e = jnp.dot(lp.reshape(Tq * nb, C), sel_ref[...],
                preferred_element_type=jnp.float32)               # (Tq*nb, S_pad)
    e_ref[...] = e.reshape(Tq, nb, S_pad)

    # ---- CTC forward (alpha) recursion, 8 rows in lockstep ----
    s_idx = lax.broadcasted_iota(jnp.int32, (1, S_pad), 1)
    mask_a1 = s_idx >= 1                          # alpha[s-1] allowed
    mask_a2 = (s_idx % 2 == 1) & (s_idx >= 3)     # skip transition (distinct labels)

    alpha0 = jnp.where(s_idx <= 1, e_ref[0], NEG)                 # (nb, S_pad)

    def logsumexp3(a, b, c):
        m = jnp.maximum(jnp.maximum(a, b), c)
        return m + jnp.log(jnp.exp(a - m) + jnp.exp(b - m) + jnp.exp(c - m))

    def body(t, alpha):
        e_t = e_ref[t]                                            # (nb, S_pad)
        a1 = jnp.where(mask_a1, pltpu.roll(alpha, shift=1, axis=1), NEG)
        a2 = jnp.where(mask_a2, pltpu.roll(alpha, shift=2, axis=1), NEG)
        alpha_new = e_t + logsumexp3(alpha, a1, a2)
        return jnp.where(t < q2, alpha_new, alpha)                # per-row freeze

    alpha = lax.fori_loop(1, qmax, body, alpha0)

    # ---- final log-likelihood: states 2k and 2k-1 at time q-1 ----
    final_mask = (s_idx == 2 * k2) | (s_idx == 2 * k2 - 1)
    af = jnp.where(final_mask, alpha, NEG)
    mf = jnp.max(af, axis=1, keepdims=True)
    ll = mf + jnp.log(jnp.sum(jnp.exp(af - mf), axis=1, keepdims=True))  # (nb, 1)

    loss = -ll / k2.astype(jnp.float32)        # CTCLoss reduction='mean', N=1 (k>=1 assumed)
    loss = jnp.where(loss < 1e20, loss, 0.0)   # zero_infinity=True
    out_ref[...] = jnp.broadcast_to(loss, out_ref.shape)


def forward_sum_loss(attn_logprob, in_lens, out_lens, blank_logprob=-1.0):
    B, _, Tq, Tk = attn_logprob.shape
    C = Tk + 1
    S_real = 2 * Tk + 1
    S_pad = ((S_real + 127) // 128) * 128

    # F.pad(..., (1, 0), value=blank_logprob) on the key axis, then time-major.
    attn = attn_logprob.reshape(B, Tq, Tk).astype(jnp.float32)
    attn = jnp.pad(attn, ((0, 0), (0, 0), (1, 0)), constant_values=blank_logprob)
    attn = jnp.transpose(attn, (1, 0, 2))                      # (Tq, B, C)

    B_pad = ((B + NB - 1) // NB) * NB
    pad_b = B_pad - B
    attn = jnp.pad(attn, ((0, 0), (0, pad_b), (0, 0)))
    in_l = jnp.pad(in_lens.astype(jnp.int32), (0, pad_b), constant_values=1)
    out_l = jnp.pad(out_lens.astype(jnp.int32), (0, pad_b), constant_values=1)

    # Host constant: one-hot label selector for extended CTC states.
    s = np.arange(S_pad)
    label = np.where(s % 2 == 0, 0, (s + 1) // 2)
    valid = s < S_real
    sel = jnp.asarray(((np.arange(C)[:, None] == label[None, :]) &
                       valid[None, :]).astype(np.float32))      # (C, S_pad)

    k_col = in_l.reshape(B_pad, 1)
    q_col = out_l.reshape(B_pad, 1)

    # VMEM budget: double-buffered input block + e scratch + resident sel + out.
    vmem_needed = (2 * Tq * NB * C + Tq * NB * S_pad + C * S_pad + 4 * NB * 128) * 4
    if vmem_needed > 12 * 1024 * 1024:
        cparams = pltpu.CompilerParams(
            dimension_semantics=("parallel",),
            vmem_limit_bytes=min(2 * vmem_needed, 64 * 1024 * 1024))
    else:
        cparams = pltpu.CompilerParams(dimension_semantics=("parallel",))

    losses = pl.pallas_call(
        _forward_sum_kernel,
        out_shape=jax.ShapeDtypeStruct((B_pad, 128), jnp.float32),
        grid_spec=pltpu.PrefetchScalarGridSpec(
            num_scalar_prefetch=1,
            grid=(B_pad // NB,),
            in_specs=[
                pl.BlockSpec((Tq, NB, C), lambda g, ol: (0, g, 0)),   # attn block
                pl.BlockSpec((C, S_pad), lambda g, ol: (0, 0)),        # resident sel
                pl.BlockSpec((NB, 1), lambda g, ol: (g, 0)),           # key lens
                pl.BlockSpec((NB, 1), lambda g, ol: (g, 0)),           # mel lens
            ],
            out_specs=pl.BlockSpec((NB, 128), lambda g, ol: (g, 0)),
            scratch_shapes=[pltpu.VMEM((Tq, NB, S_pad), jnp.float32)],
        ),
        compiler_params=cparams,
    )(out_l, attn, sel, k_col, q_col)

    return jnp.sum(losses[:B, 0]) / B


def _reference_numpy(attn_logprob, in_lens, out_lens, blank_logprob=-1.0):
    """Pure numpy replica of the PyTorch ForwardSumLoss forward."""
    attn = np.asarray(attn_logprob, dtype=np.float64)
    B = attn.shape[0]
    total = 0.0
    for bid in range(B):
        k = int(in_lens[bid])
        q = int(out_lens[bid])
        lp = attn[bid, 0, :q, :k]
        lp = np.concatenate([np.full((q, 1), blank_logprob), lp], axis=1)
        mx = lp.max(axis=1, keepdims=True)
        lp = lp - (mx + np.log(np.exp(lp - mx).sum(axis=1, keepdims=True)))

        def label(s):
            return 0 if s % 2 == 0 else (s + 1) // 2

        S = 2 * k + 1
        alpha = np.full(S, -np.inf)
        alpha[0] = lp[0, 0]
        alpha[1] = lp[0, label(1)]
        for t in range(1, q):
            new = np.full(S, -np.inf)
            for s in range(S):
                v = alpha[s]
                if s >= 1:
                    v = np.logaddexp(v, alpha[s - 1])
                if s >= 3 and s % 2 == 1:
                    v = np.logaddexp(v, alpha[s - 2])
                new[s] = v + lp[t, label(s)]
            alpha = new
        ll = np.logaddexp(alpha[2 * k], alpha[2 * k - 1])
        loss = -ll / k
        if not np.isfinite(loss):   # zero_infinity=True
            loss = 0.0
        total += loss
    return total / B


if __name__ == "__main__":
    B, Tq, Tk = 2, 16, 8
    key = jax.random.PRNGKey(0)
    attn_logprob = jax.random.normal(key, (B, 1, Tq, Tk), dtype=jnp.float32)
    in_lens = jnp.array([8, 6], dtype=jnp.int32)     # key (text) lengths
    out_lens = jnp.array([16, 12], dtype=jnp.int32)  # query (mel) lengths

    loss = forward_sum_loss(attn_logprob, in_lens, out_lens)
    loss = jax.block_until_ready(loss)

    ref = _reference_numpy(np.asarray(attn_logprob),
                           np.asarray(in_lens), np.asarray(out_lens))
    np.testing.assert_allclose(float(loss), ref, rtol=2e-3, atol=2e-3)
    print("KERNEL_OK")
</pallas_src>

<mosaic_0001>
module attributes {stable_mosaic.version = 11 : i64} {
  func.func @_forward_sum_kernel(%arg0: i32, %arg1: memref<8xi32, #tpu.memory_space<smem>>, %arg2: memref<16x8x9xf32, #tpu.memory_space<vmem>>, %arg3: memref<9x128xf32, #tpu.memory_space<vmem>>, %arg4: memref<8x1xi32, #tpu.memory_space<vmem>>, %arg5: memref<8x1xi32, #tpu.memory_space<vmem>>, %arg6: memref<8x128xf32, #tpu.memory_space<vmem>>, %arg7: memref<16x8x128xf32, #tpu.memory_space<vmem>>) attributes {dimension_semantics = [#tpu.dimension_semantics<parallel>], iteration_bounds = array<i64: 1>, scalar_prefetch = 1 : i64, scratch_operands = 1 : i64, tpu.core_type = #tpu.core_type<tc>, window_params = [{transform_indices = @transform_0, window_bounds = array<i64: 16, 8, 9>}, {pipeline_mode = #tpu.pipeline_mode<synchronous>, transform_indices = @transform_1, window_bounds = array<i64: 9, 128>}, {transform_indices = @transform_2, window_bounds = array<i64: 8, 1>}, {transform_indices = @transform_3, window_bounds = array<i64: 8, 1>}, {transform_indices = @transform_4, window_bounds = array<i64: 8, 128>}]} {
    %c8_i32 = arith.constant 8 : i32
    %0 = arith.muli %arg0, %c8_i32 : i32
    %1 = arith.index_cast %0 : i32 to index
    %2 = memref.load %arg1[%1] : memref<8xi32, #tpu.memory_space<smem>>
    %c1_i32 = arith.constant 1 : i32
    %3 = arith.addi %0, %c1_i32 : i32
    %4 = arith.index_cast %3 : i32 to index
    %5 = memref.load %arg1[%4] : memref<8xi32, #tpu.memory_space<smem>>
    %6 = arith.maxsi %2, %5 : i32
    %c2_i32 = arith.constant 2 : i32
    %7 = arith.addi %0, %c2_i32 : i32
    %8 = arith.index_cast %7 : i32 to index
    %9 = memref.load %arg1[%8] : memref<8xi32, #tpu.memory_space<smem>>
    %10 = arith.maxsi %6, %9 : i32
    %c3_i32 = arith.constant 3 : i32
    %11 = arith.addi %0, %c3_i32 : i32
    %12 = arith.index_cast %11 : i32 to index
    %13 = memref.load %arg1[%12] : memref<8xi32, #tpu.memory_space<smem>>
    %14 = arith.maxsi %10, %13 : i32
    %c4_i32 = arith.constant 4 : i32
    %15 = arith.addi %0, %c4_i32 : i32
    %16 = arith.index_cast %15 : i32 to index
    %17 = memref.load %arg1[%16] : memref<8xi32, #tpu.memory_space<smem>>
    %18 = arith.maxsi %14, %17 : i32
    %c5_i32 = arith.constant 5 : i32
    %19 = arith.addi %0, %c5_i32 : i32
    %20 = arith.index_cast %19 : i32 to index
    %21 = memref.load %arg1[%20] : memref<8xi32, #tpu.memory_space<smem>>
    %22 = arith.maxsi %18, %21 : i32
    %c6_i32 = arith.constant 6 : i32
    %23 = arith.addi %0, %c6_i32 : i32
    %24 = arith.index_cast %23 : i32 to index
    %25 = memref.load %arg1[%24] : memref<8xi32, #tpu.memory_space<smem>>
    %26 = arith.maxsi %22, %25 : i32
    %c7_i32 = arith.constant 7 : i32
    %27 = arith.addi %0, %c7_i32 : i32
    %28 = arith.index_cast %27 : i32 to index
    %29 = memref.load %arg1[%28] : memref<8xi32, #tpu.memory_space<smem>>
    %30 = arith.maxsi %26, %29 : i32
    %c0 = arith.constant 0 : index
    %c0_0 = arith.constant 0 : index
    %31 = vector.load %arg4[%c0, %c0_0] : memref<8x1xi32, #tpu.memory_space<vmem>>, vector<8x1xi32>
    %c0_1 = arith.constant 0 : index
    %c0_2 = arith.constant 0 : index
    %32 = vector.load %arg5[%c0_1, %c0_2] : memref<8x1xi32, #tpu.memory_space<vmem>>, vector<8x1xi32>
    %33 = vector.shape_cast %31 : vector<8x1xi32> to vector<1x8x1xi32>
    %c0_3 = arith.constant 0 : index
    %c0_4 = arith.constant 0 : index
    %c0_5 = arith.constant 0 : index
    %34 = vector.load %arg2[%c0_3, %c0_4, %c0_5] : memref<16x8x9xf32, #tpu.memory_space<vmem>>, vector<16x8x9xf32>
    %35 = tpu.iota {dimensions = array<i32: 2>} : vector<16x8x9xi32>
    %36 = vector.broadcast %33 : vector<1x8x1xi32> to vector<16x8x9xi32>
    %37 = arith.cmpi sle, %35, %36 : vector<16x8x9xi32>
    %cst = arith.constant -1.000000e+30 : f32
    %38 = vector.broadcast %cst : f32 to vector<16x8x9xf32>
    %39 = arith.select %37, %34, %38 : vector<16x8x9xi1>, vector<16x8x9xf32>
    %cst_6 = arith.constant dense<0xFF800000> : vector<16x8xf32>
    %40 = vector.multi_reduction <maximumf>, %39, %cst_6 [2] : vector<16x8x9xf32> to vector<16x8xf32>
    %41 = vector.shape_cast %40 : vector<16x8xf32> to vector<16x8x1xf32>
    %42 = vector.broadcast %41 : vector<16x8x1xf32> to vector<16x8x9xf32>
    %43 = arith.subf %39, %42 : vector<16x8x9xf32>
    %44 = math.exp %43 : vector<16x8x9xf32>
    %cst_7 = arith.constant dense<0.000000e+00> : vector<16x8xf32>
    %45 = vector.multi_reduction <add>, %44, %cst_7 [2] : vector<16x8x9xf32> to vector<16x8xf32>
    %46 = vector.shape_cast %45 : vector<16x8xf32> to vector<16x8x1xf32>
    %47 = math.log %46 : vector<16x8x1xf32>
    %48 = arith.addf %41, %47 : vector<16x8x1xf32>
    %49 = vector.broadcast %48 : vector<16x8x1xf32> to vector<16x8x9xf32>
    %50 = arith.subf %39, %49 : vector<16x8x9xf32>
    %51 = vector.shape_cast %50 : vector<16x8x9xf32> to vector<128x9xf32>
    %c0_8 = arith.constant 0 : index
    %c0_9 = arith.constant 0 : index
    %52 = vector.load %arg3[%c0_8, %c0_9] : memref<9x128xf32, #tpu.memory_space<vmem>>, vector<9x128xf32>
    %cst_10 = arith.constant dense<0.000000e+00> : vector<128x128xf32>
    %53 = tpu.matmul %51, %52, %cst_10 {dimension_numbers = #tpu.dot_dimension_numbers<[1], [0], [0], [1], [0, 0, 1, 1], [], []>} : vector<128x9xf32>, vector<9x128xf32>, vector<128x128xf32> -> vector<128x128xf32>
    %54 = vector.shape_cast %53 : vector<128x128xf32> to vector<16x8x128xf32>
    %c0_11 = arith.constant 0 : index
    %c0_12 = arith.constant 0 : index
    %c0_13 = arith.constant 0 : index
    %55 = vector.load %arg7[%c0_11, %c0_12, %c0_13] : memref<16x8x128xf32, #tpu.memory_space<vmem>>, vector<16x8x128xf32>
    tpu.vector_store %arg7[%c0_11, %c0_12, %c0_13], %54 {strides = array<i32>} : memref<16x8x128xf32, #tpu.memory_space<vmem>>, vector<16x8x128xf32>,
    %56 = tpu.iota {dimensions = array<i32: 1>} : vector<1x128xi32>
    %c1_i32_14 = arith.constant 1 : i32
    %57 = vector.broadcast %c1_i32_14 : i32 to vector<1x128xi32>
    %58 = arith.cmpi sge, %56, %57 : vector<1x128xi32>
    %c2_i32_15 = arith.constant 2 : i32
    %c0_i32 = arith.constant 0 : i32
    %59 = arith.cmpi eq, %c2_i32_15, %c0_i32 : i32
    %c1_i32_16 = arith.constant 1 : i32
    %60 = arith.select %59, %c1_i32_16, %c2_i32_15 : i32
    %61 = vector.broadcast %60 : i32 to vector<1x128xi32>
    %62 = arith.remsi %56, %61 : vector<1x128xi32>
    %c0_i32_17 = arith.constant 0 : i32
    %63 = vector.broadcast %c0_i32_17 : i32 to vector<1x128xi32>
    %64 = arith.cmpi ne, %62, %63 : vector<1x128xi32>
    %c0_i32_18 = arith.constant 0 : i32
    %65 = vector.broadcast %c0_i32_18 : i32 to vector<1x128xi32>
    %66 = arith.cmpi slt, %62, %65 : vector<1x128xi32>
    %c0_i32_19 = arith.constant 0 : i32
    %67 = arith.cmpi slt, %60, %c0_i32_19 : i32
    %68 = vector.broadcast %67 : i1 to vector<1x128xi1>
    %69 = vector.broadcast %68 : vector<1x128xi1> to vector<1x128xi1>
    %70 = arith.xori %66, %69 : vector<1x128xi1>
    %71 = arith.andi %70, %64 : vector<1x128xi1>
    %72 = vector.broadcast %60 : i32 to vector<1x128xi32>
    %73 = arith.addi %62, %72 : vector<1x128xi32>
    %74 = arith.select %71, %73, %62 : vector<1x128xi1>, vector<1x128xi32>
    %c1_i32_20 = arith.constant 1 : i32
    %75 = vector.broadcast %c1_i32_20 : i32 to vector<1x128xi32>
    %76 = arith.cmpi eq, %74, %75 : vector<1x128xi32>
    %c3_i32_21 = arith.constant 3 : i32
    %77 = vector.broadcast %c3_i32_21 : i32 to vector<1x128xi32>
    %78 = arith.cmpi sge, %56, %77 : vector<1x128xi32>
    %79 = arith.andi %76, %78 : vector<1x128xi1>
    %c1_i32_22 = arith.constant 1 : i32
    %80 = vector.broadcast %c1_i32_22 : i32 to vector<1x128xi32>
    %81 = arith.cmpi sle, %56, %80 : vector<1x128xi32>
    %c0_23 = arith.constant 0 : index
    %c0_24 = arith.constant 0 : index
    %c0_25 = arith.constant 0 : index
    %82 = vector.load %arg7[%c0_23, %c0_24, %c0_25] : memref<16x8x128xf32, #tpu.memory_space<vmem>>, vector<1x8x128xf32>
    %83 = vector.shape_cast %82 : vector<1x8x128xf32> to vector<8x128xf32>
    %cst_26 = arith.constant -1.000000e+30 : f32
    %84 = vector.shape_cast %81 : vector<1x128xi1> to vector<1x128xi1>
    %85 = vector.broadcast %84 : vector<1x128xi1> to vector<8x128xi1>
    %86 = vector.broadcast %cst_26 : f32 to vector<8x128xf32>
    %87 = arith.select %85, %83, %86 : vector<8x128xi1>, vector<8x128xf32>
    %c1_i32_27 = arith.constant 1 : i32
    %88 = arith.subi %30, %c1_i32_27 : i32
    %89 = arith.addi %c1_i32_27, %88 : i32
    %c1_i32_28 = arith.constant 1 : i32
    %90 = scf.for %arg8 = %c1_i32_27 to %89 step %c1_i32_28 iter_args(%arg9 = %87) -> (vector<8x128xf32>)  : i32 {
      %126 = arith.index_cast %arg8 : i32 to index
      %c0_40 = arith.constant 0 : index
      %c0_41 = arith.constant 0 : index
      %127 = vector.load %arg7[%126, %c0_40, %c0_41] : memref<16x8x128xf32, #tpu.memory_space<vmem>>, vector<1x8x128xf32>
      %128 = vector.shape_cast %127 : vector<1x8x128xf32> to vector<8x128xf32>
      %c1_i32_42 = arith.constant 1 : i32
      %129 = tpu.dynamic_rotate %arg9 by %c1_i32_42 dim 1 : vector<8x128xf32>, i32 -> vector<8x128xf32>
      %cst_43 = arith.constant -1.000000e+30 : f32
      %130 = vector.shape_cast %58 : vector<1x128xi1> to vector<1x128xi1>
      %131 = vector.broadcast %130 : vector<1x128xi1> to vector<8x128xi1>
      %132 = vector.broadcast %cst_43 : f32 to vector<8x128xf32>
      %133 = arith.select %131, %129, %132 : vector<8x128xi1>, vector<8x128xf32>
      %c2_i32_44 = arith.constant 2 : i32
      %134 = tpu.dynamic_rotate %arg9 by %c2_i32_44 dim 1 : vector<8x128xf32>, i32 -> vector<8x128xf32>
      %cst_45 = arith.constant -1.000000e+30 : f32
      %135 = vector.shape_cast %79 : vector<1x128xi1> to vector<1x128xi1>
      %136 = vector.broadcast %135 : vector<1x128xi1> to vector<8x128xi1>
      %137 = vector.broadcast %cst_45 : f32 to vector<8x128xf32>
      %138 = arith.select %136, %134, %137 : vector<8x128xi1>, vector<8x128xf32>
      %139 = arith.maximumf %arg9, %133 : vector<8x128xf32>
      %140 = arith.maximumf %139, %138 : vector<8x128xf32>
      %141 = arith.subf %arg9, %140 : vector<8x128xf32>
      %142 = math.exp %141 : vector<8x128xf32>
      %143 = arith.subf %133, %140 : vector<8x128xf32>
      %144 = math.exp %143 : vector<8x128xf32>
      %145 = arith.addf %142, %144 : vector<8x128xf32>
      %146 = arith.subf %138, %140 : vector<8x128xf32>
      %147 = math.exp %146 : vector<8x128xf32>
      %148 = arith.addf %145, %147 : vector<8x128xf32>
      %149 = math.log %148 : vector<8x128xf32>
      %150 = arith.addf %140, %149 : vector<8x128xf32>
      %151 = arith.addf %128, %150 : vector<8x128xf32>
      %152 = vector.broadcast %arg8 : i32 to vector<8x1xi32>
      %153 = arith.cmpi slt, %152, %32 : vector<8x1xi32>
      %154 = vector.shape_cast %153 : vector<8x1xi1> to vector<8x1xi1>
      %155 = vector.broadcast %154 : vector<8x1xi1> to vector<8x128xi1>
      %156 = arith.select %155, %151, %arg9 : vector<8x128xi1>, vector<8x128xf32>
      scf.yield %156 : vector<8x128xf32>
    }
    %c2_i32_29 = arith.constant 2 : i32
    %91 = vector.broadcast %c2_i32_29 : i32 to vector<8x1xi32>
    %92 = arith.muli %91, %31 : vector<8x1xi32>
    %93 = vector.broadcast %56 : vector<1x128xi32> to vector<8x128xi32>
    %94 = vector.broadcast %92 : vector<8x1xi32> to vector<8x128xi32>
    %95 = arith.cmpi eq, %93, %94 : vector<8x128xi32>
    %c2_i32_30 = arith.constant 2 : i32
    %96 = vector.broadcast %c2_i32_30 : i32 to vector<8x1xi32>
    %97 = arith.muli %96, %31 : vector<8x1xi32>
    %c1_i32_31 = arith.constant 1 : i32
    %98 = vector.broadcast %c1_i32_31 : i32 to vector<8x1xi32>
    %99 = arith.subi %97, %98 : vector<8x1xi32>
    %100 = vector.broadcast %56 : vector<1x128xi32> to vector<8x128xi32>
    %101 = vector.broadcast %99 : vector<8x1xi32> to vector<8x128xi32>
    %102 = arith.cmpi eq, %100, %101 : vector<8x128xi32>
    %103 = arith.ori %95, %102 : vector<8x128xi1>
    %cst_32 = arith.constant -1.000000e+30 : f32
    %104 = vector.broadcast %cst_32 : f32 to vector<8x128xf32>
    %105 = arith.select %103, %90, %104 : vector<8x128xi1>, vector<8x128xf32>
    %cst_33 = arith.constant dense<0xFF800000> : vector<8xf32>
    %106 = vector.multi_reduction <maximumf>, %105, %cst_33 [1] : vector<8x128xf32> to vector<8xf32>
    %107 = vector.shape_cast %106 : vector<8xf32> to vector<8x1xf32>
    %108 = vector.broadcast %107 : vector<8x1xf32> to vector<8x128xf32>
    %109 = arith.subf %105, %108 : vector<8x128xf32>
    %110 = math.exp %109 : vector<8x128xf32>
    %cst_34 = arith.constant dense<0.000000e+00> : vector<8xf32>
    %111 = vector.multi_reduction <add>, %110, %cst_34 [1] : vector<8x128xf32> to vector<8xf32>
    %112 = vector.shape_cast %111 : vector<8xf32> to vector<8x1xf32>
    %113 = math.log %112 : vector<8x1xf32>
    %114 = arith.addf %107, %113 : vector<8x1xf32>
    %cst_35 = arith.constant 0.000000e+00 : f32
    %115 = vector.broadcast %cst_35 : f32 to vector<8x1xf32>
    %116 = arith.subf %115, %114 : vector<8x1xf32>
    %117 = arith.sitofp %31 : vector<8x1xi32> to vector<8x1xf32>
    %118 = arith.divf %116, %117 : vector<8x1xf32>
    %cst_36 = arith.constant 1.000000e+20 : f32
    %119 = vector.broadcast %cst_36 : f32 to vector<8x1xf32>
    %120 = arith.cmpf olt, %118, %119 : vector<8x1xf32>
    %cst_37 = arith.constant 0.000000e+00 : f32
    %121 = vector.broadcast %cst_37 : f32 to vector<8x1xf32>
    %122 = arith.select %120, %118, %121 : vector<8x1xi1>, vector<8x1xf32>
    %123 = vector.shape_cast %122 : vector<8x1xf32> to vector<8x1xf32>
    %124 = vector.broadcast %123 : vector<8x1xf32> to vector<8x128xf32>
    %c0_38 = arith.constant 0 : index
    %c0_39 = arith.constant 0 : index
    %125 = vector.load %arg6[%c0_38, %c0_39] : memref<8x128xf32, #tpu.memory_space<vmem>>, vector<8x128xf32>
    tpu.vector_store %arg6[%c0_38, %c0_39], %124 {strides = array<i32>} : memref<8x128xf32, #tpu.memory_space<vmem>>, vector<8x128xf32>,
    return
  }
  func.func @transform_0(%arg0: i32, %arg1: memref<8xi32, #tpu.memory_space<smem>>) -> (i32, i32, i32) {
    %c0_i32 = arith.constant 0 : i32
    %c0_i32_0 = arith.constant 0 : i32
    %c0_i32_1 = arith.constant 0 : i32
    return %c0_i32, %arg0, %c0_i32_0 : i32, i32, i32
  }
  func.func @transform_1(%arg0: i32, %arg1: memref<8xi32, #tpu.memory_space<smem>>) -> (i32, i32) {
    %c0_i32 = arith.constant 0 : i32
    %c0_i32_0 = arith.constant 0 : i32
    %c0_i32_1 = arith.constant 0 : i32
    return %c0_i32, %c0_i32_0 : i32, i32
  }
  func.func @transform_2(%arg0: i32, %arg1: memref<8xi32, #tpu.memory_space<smem>>) -> (i32, i32) {
    %c0_i32 = arith.constant 0 : i32
    %c0_i32_0 = arith.constant 0 : i32
    return %arg0, %c0_i32 : i32, i32
  }
  func.func @transform_3(%arg0: i32, %arg1: memref<8xi32, #tpu.memory_space<smem>>) -> (i32, i32) {
    %c0_i32 = arith.constant 0 : i32
    %c0_i32_0 = arith.constant 0 : i32
    return %arg0, %c0_i32 : i32, i32
  }
  func.func @transform_4(%arg0: i32, %arg1: memref<8xi32, #tpu.memory_space<smem>>) -> (i32, i32) {
    %c0_i32 = arith.constant 0 : i32
    %c0_i32_0 = arith.constant 0 : i32
    return %arg0, %c0_i32 : i32, i32
  }
}

</mosaic_0001>

<bundles_post_ra>
// kernel: tpu_custom_call.1
= control target key start
LH: loop header
LB: loop body
LE: loop exit
PB: predicated region body
PF: predicated region fallthrough
CT: control target
= control target key end

     0   :  { %s790_s21 = smov [#allocation4]   ;;  %s1170_s0 = inlined_call_operand.vmem [shape: s32[8], index: 0, kind: input, shape index: {}]   ;;  %s1171_s1 = inlined_call_operand.vmem [shape: f32[16,8,9], index: 1, kind: input, shape index: {}]   ;;  %s1172_s2 = inlined_call_operand.vmem [shape: f32[9,128], index: 2, kind: input, shape index: {}]   ;;  %s1173_s3 = inlined_call_operand.vmem [shape: s32[8,1], index: 3, kind: input, shape index: {}]   ;;  %s1174_s4 = inlined_call_operand.vmem [shape: s32[8,1], index: 4, kind: input, shape index: {}]   ;;  %s1175_s5 = inlined_call_operand.hbm [shape: f32[8,128], index: 5, kind: output, shape index: {}]  }
   0x1   :  { %s11_s20 = sshll.u32 %s1170_s0, 4  ;;  %s12_s20 = int_to_ptr.vmem [resolvable:$true] %s11_s20 }
   0x2   :  { %14 = dma.vmem_to_smem %s12_s20, 16, %s790_s21, [#allocation3] }
   0x3   :  { %774 = dma.done.wait [#allocation3], 16 }
   0x4   :  { %775 = vsyncadd [#allocation3], 4294967280 }
   0x5   :  { %17 = sfence }
   0x6   :  { %v832_v0 = vld [vmem:[%s1173_s3] sm:$0xff]  ;;  %v75_v1 = vlaneseq }
   0x7   :  { %18 = vsyncpa [#allocation6], 0  ;;  %v791_v2 = vmov 0   ;;  %v71_v6 = vld [vmem:[%s1171_s1 + $0x60] sm:$0xff]  ;;  %vm97_vm4 = vcmask 72704   ;;  %v66_v17 = vld [vmem:[%s1171_s1 + $0x38] sm:$0xff] }
   0x8   :  { %643 = vset.pattern.permute.xlu0 %v791_v2  ;;  %v836_v3 = vand.u32 127, %v75_v1  ;;  %v67_v7 = vld [vmem:[%s1171_s1 + $0x40] sm:$0xff]  ;;  %v68_v19 = vld [vmem:[%s1171_s1 + $0x48] sm:$0xff]  ;;  %v69_v33 = vld [vmem:[%s1171_s1 + $0x50] sm:$0xff]  ;;  %s580_s27 = sld [smem:[#allocation4 + $0x1]]  ;;  %vm356_vm6 = vcmask 1040384  }
   0x9   :  { %78 = vperm.xlu0 %643, %v832_v0   ;;  %v63_v8 = vld [vmem:[%s1171_s1 + $0x20] sm:$0xff]  ;;  %v72_v26 = vld [vmem:[%s1171_s1 + $0x68] sm:$0xff]  ;;  %v73_v38 = vld [vmem:[%s1171_s1 + $0x70] sm:$0xff]  ;;  %s581_s28 = sld [smem:[#allocation4 + $0x2]] }
   0xa   :  { %vm441_vm0 = vcmp.ge.s32.totalorder %v836_v3, 1  ;;  %v446_v4 = vand.u32 1, %v836_v3  ;;  %vm455_vm1 = vcmp.ge.s32.totalorder %v836_v3, 3  ;;  %v59_v18 = vld [vmem:[%s1171_s1] sm:$0xff]  ;;  %v60_v27 = vld [vmem:[%s1171_s1 + $0x8] sm:$0xff]  ;;  %v61_v39 = vld [vmem:[%s1171_s1 + $0x10] sm:$0xff] }
   0xb   :  { %v64_v32 = vld [vmem:[%s1171_s1 + $0x28] sm:$0xff]  ;;  %v65_v44 = vld [vmem:[%s1171_s1 + $0x30] sm:$0xff]  ;;  %v70_v45 = vld [vmem:[%s1171_s1 + $0x58] sm:$0xff]  ;;  %s1045_s29 = sld [smem:[#allocation4 + $0x3]]  ;;  %vm457_vm7 = vcmp.le.s32.totalorder %v836_v3, 1 }
   0xc   :  { %vm454_vm2 = vcmp.eq.s32.totalorder %v446_v4, 1  ;;  %v74_v50 = vld [vmem:[%s1171_s1 + $0x78] sm:$0xff]  ;;  %s583_s30 = sld [smem:[#allocation4 + $0x4]] }
   0xd   :  { %vm841_vm3 = vmand %vm454_vm2, %vm455_vm1  ;;  %v62_v51 = vld [vmem:[%s1171_s1 + $0x18] sm:$0xff]  ;;  %s28_s1 = sld [smem:[#allocation4]] }
   0xe   :  { %s1060_s6 = sld [smem:[#allocation4 + $0x5]] }
   0xf   :  { %s585_s7 = sld [smem:[#allocation4 + $0x6]] }
  0x10   :  { %s586_s8 = sld [smem:[#allocation4 + $0x7]] }
  0x13   :  { %p31_p0 = scmp.gt.s32.totalorder %s28_s1, %s580_s27 }
  0x15   :  { %s1181_s1 = smov (!%p31_p0, %s28_s1), %s580_s27 }
  0x16   :  { %p35_p1 = scmp.gt.s32.totalorder %s1181_s1, %s581_s28 }
  0x18   :  { %s1183_s1 = smov (!%p35_p1, %s1181_s1), %s581_s28 }
  0x19   :  { %p39_p2 = scmp.gt.s32.totalorder %s1183_s1, %s1045_s29 }
  0x1b   :  { %s1185_s1 = smov (!%p39_p2, %s1183_s1), %s1045_s29 }
  0x1c   :  { %p43_p3 = scmp.gt.s32.totalorder %s1185_s1, %s583_s30 }
  0x1e   :  { %s1187_s1 = smov (!%p43_p3, %s1185_s1), %s583_s30 }
  0x1f   :  { %p47_p4 = scmp.gt.s32.totalorder %s1187_s1, %s1060_s6 }
  0x21   :  { %s1189_s1 = smov (!%p47_p4, %s1187_s1), %s1060_s6 }
  0x22   :  { %p51_p5 = scmp.gt.s32.totalorder %s1189_s1, %s585_s7 }
  0x24   :  { %s1191_s1 = smov (!%p51_p5, %s1189_s1), %s585_s7 }
  0x25   :  { %p55_p6 = scmp.gt.s32.totalorder %s1191_s1, %s586_s8 }
  0x27   :  { %s1193_s1 = smov (!%p55_p6, %s1191_s1), %s586_s8 }
  0x28   :  { %p604_p7 = scmp.le.s32.totalorder %s1193_s1, 1 }
  0x7b   :  { %v79_v9 = vpop.permute.xlu0 %78 }
  0x7c   :  { %vm855_vm5 = vcmp.le.s32.totalorder %v836_v3, %v79_v9 }
  0x7d   :  { %v861_v11 = vsel %vm855_vm5, %v71_v6, -1e+30  ;;  %v865_v12 = vsel %vm855_vm5, %v67_v7, -1e+30  ;;  %v869_v13 = vsel %vm855_vm5, %v63_v8, -1e+30 }
  0x7e   :  { %v134_v14 = vsel %vm97_vm4, %v861_v11, -inf  ;;  %v122_v15 = vsel %vm97_vm4, %v865_v12, -inf  ;;  %v110_v16 = vsel %vm97_vm4, %v869_v13, -inf  ;;  %v888_v20 = vsel %vm855_vm5, %v66_v17, -1e+30 }
  0x7f   :  { %135 = vmax.xlane.f32.xlu1 %v134_v14  ;;  %123 = vmax.xlane.f32.xlu0 %v122_v15  ;;  %v892_v21 = vsel %vm855_vm5, %v59_v18, -1e+30  ;;  %v896_v22 = vsel %vm855_vm5, %v68_v19, -1e+30  ;;  %v119_v23 = vsel %vm97_vm4, %v888_v20, -inf }
  0x80   :  { %111 = vmax.xlane.f32.xlu2 %v110_v16  ;;  %v98_v24 = vsel %vm97_vm4, %v892_v21, -inf  ;;  %v125_v25 = vsel %vm97_vm4, %v896_v22, -inf  ;;  %v912_v28 = vsel %vm855_vm5, %v72_v26, -1e+30  ;;  %v916_v29 = vsel %vm855_vm5, %v60_v27, -1e+30 }
  0x81   :  { %v137_v30 = vsel %vm97_vm4, %v912_v28, -inf  ;;  %v101_v31 = vsel %vm97_vm4, %v916_v29, -inf  ;;  %v930_v34 = vsel %vm855_vm5, %v64_v32, -1e+30  ;;  %v934_v35 = vsel %vm855_vm5, %v69_v33, -1e+30 }
  0x82   :  { %v113_v36 = vsel %vm97_vm4, %v930_v34, -inf  ;;  %v128_v37 = vsel %vm97_vm4, %v934_v35, -inf  ;;  %v948_v40 = vsel %vm855_vm5, %v73_v38, -1e+30  ;;  %v952_v41 = vsel %vm855_vm5, %v61_v39, -1e+30 }
  0x83   :  { %v140_v42 = vsel %vm97_vm4, %v948_v40, -inf  ;;  %v104_v43 = vsel %vm97_vm4, %v952_v41, -inf  ;;  %v966_v46 = vsel %vm855_vm5, %v65_v44, -1e+30  ;;  %v970_v47 = vsel %vm855_vm5, %v70_v45, -1e+30 }
  0x84   :  { %v116_v48 = vsel %vm97_vm4, %v966_v46, -inf  ;;  %v131_v49 = vsel %vm97_vm4, %v970_v47, -inf  ;;  %v984_v52 = vsel %vm855_vm5, %v74_v50, -1e+30  ;;  %v988_v53 = vsel %vm855_vm5, %v62_v51, -1e+30 }
  0x85   :  { %v143_v54 = vsel %vm97_vm4, %v984_v52, -inf  ;;  %v107_v55 = vsel %vm97_vm4, %v988_v53, -inf }
  0x87   :  { %120 = vmax.xlane.f32.xlu0 %v119_v23  ;;  %99 = vmax.xlane.f32.xlu1 %v98_v24 }
  0x88   :  { %126 = vmax.xlane.f32.xlu2 %v125_v25 }
  0x8f   :  { %138 = vmax.xlane.f32.xlu1 %v137_v30 }
  0x90   :  { %102 = vmax.xlane.f32.xlu2 %v101_v31 }
  0x97   :  { %114 = vmax.xlane.f32.xlu1 %v113_v36 }
  0x98   :  { %129 = vmax.xlane.f32.xlu2 %v128_v37 }
  0x9f   :  { %141 = vmax.xlane.f32.xlu1 %v140_v42 }
  0xa0   :  { %105 = vmax.xlane.f32.xlu2 %v104_v43 }
  0xa7   :  { %117 = vmax.xlane.f32.xlu1 %v116_v48 }
  0xa8   :  { %132 = vmax.xlane.f32.xlu2 %v131_v49 }
  0xaf   :  { %144 = vmax.xlane.f32.xlu1 %v143_v54 }
  0xb0   :  { %108 = vmax.xlane.f32.xlu2 %v107_v55 }
  0xf2   :  { %v994_v56 = vpop.xlane.xlu1 %135  ;;  %v996_v57 = vpop.xlane.xlu0 %123 }
  0xf3   :  { %v158_v58 = vsub.f32 %v861_v11, %v994_v56  ;;  %v154_v59 = vsub.f32 %v865_v12, %v996_v57  ;;  %v1002_v60 = vpop.xlane.xlu2 %111 }
  0xf4   :  { %v150_v63 = vsub.f32 %v869_v13, %v1002_v60 }
  0xf5   :  { %v186_v61 = vmul.f32 1.442695, %v158_v58  ;;  %v178_v62 = vmul.f32 1.442695, %v154_v59 }
  0xf6   :  { %v170_v1 = vmul.f32 1.442695, %v150_v63 }
  0xf7   :  { %644 = vpow2.f32 %v186_v61 }
  0xf8   :  { %646 = vpow2.f32 %v178_v62 }
  0xf9   :  { %648 = vpow2.f32 %v170_v1 }
  0xfa   :  { %v1006_v4 = vpop.xlane.xlu1 %99 }
  0xfb   :  { %v1008_v6 = vpop.xlane.xlu2 %126  ;;  %v146_v7 = vsub.f32 %v892_v21, %v1006_v4 }
  0xfc   :  { %v155_v8 = vsub.f32 %v896_v22, %v1008_v6 }
  0xfd   :  { %v645_v9 = vpop.eup %644  ;;  %v162_v10 = vmul.f32 1.442695, %v146_v7 }
  0xfe   :  { %v647_v14 = vpop.eup %646  ;;  %v180_v15 = vmul.f32 1.442695, %v155_v8  ;;  %v230_v16 = vsel %vm97_vm4, %v645_v9, 0.0  ;;  %v1051_v9 = vpop.xlane.xlu0 %120 }
  0xff   :  { %231 = vadd.xlane.f32.xlu2 %v230_v16  ;;  %v218_v17 = vsel %vm97_vm4, %v647_v14, 0.0  ;;  %v649_v24 = vpop.eup %648 }
 0x100   :  { %650 = vpow2.f32 %v180_v15  ;;  %219 = vadd.xlane.f32.xlu1 %v218_v17  ;;  %v206_v33 = vsel %vm97_vm4, %v649_v24, 0.0  ;;  %v153_v24 = vsub.f32 %v888_v20, %v1051_v9 }
 0x101   :  { %652 = vpow2.f32 %v162_v10 }
 0x102   :  { %v1016_v18 = vpop.xlane.xlu1 %138 }
 0x103   :  { %v1018_v19 = vpop.xlane.xlu2 %102  ;;  %v159_v23 = vsub.f32 %v912_v28, %v1016_v18 }
 0x104   :  { %v147_v25 = vsub.f32 %v916_v29, %v1018_v19 }
 0x105   :  { %v188_v26 = vmul.f32 1.442695, %v159_v23 }
 0x106   :  { %v651_v27 = vpop.eup %650  ;;  %v164_v30 = vmul.f32 1.442695, %v147_v25 }
 0x107   :  { %v653_v31 = vpop.eup %652  ;;  %654 = vpow2.f32 %v188_v26  ;;  %v221_v32 = vsel %vm97_vm4, %v651_v27, 0.0 }
 0x108   :  { %656 = vpow2.f32 %v164_v30  ;;  %222 = vadd.xlane.f32.xlu2 %v221_v32  ;;  %207 = vadd.xlane.f32.xlu1 %v206_v33  ;;  %v194_v36 = vsel %vm97_vm4, %v653_v31, 0.0  ;;  %v176_v30 = vmul.f32 1.442695, %v153_v24 }
 0x109   :  { %195 = vadd.xlane.f32.xlu0 %v194_v36 }
 0x10a   :  { %v1027_v37 = vpop.xlane.xlu1 %114 }
 0x10b   :  { %v1029_v38 = vpop.xlane.xlu2 %129  ;;  %v151_v39 = vsub.f32 %v930_v34, %v1027_v37 }
 0x10c   :  { %v156_v42 = vsub.f32 %v934_v35, %v1029_v38 }
 0x10d   :  { %v655_v43 = vpop.eup %654  ;;  %v172_v44 = vmul.f32 1.442695, %v151_v39 }
 0x10e   :  { %v657_v45 = vpop.eup %656  ;;  %v182_v48 = vmul.f32 1.442695, %v156_v42  ;;  %v233_v49 = vsel %vm97_vm4, %v655_v43, 0.0 }
 0x10f   :  { %658 = vpow2.f32 %v172_v44  ;;  %v197_v50 = vsel %vm97_vm4, %v657_v45, 0.0 }
 0x110   :  { %660 = vpow2.f32 %v182_v48  ;;  %198 = vadd.xlane.f32.xlu1 %v197_v50 }
 0x111   :  { %234 = vadd.xlane.f32.xlu0 %v233_v49 }
 0x112   :  { %v1037_v51 = vpop.xlane.xlu1 %141 }
 0x113   :  { %v1039_v54 = vpop.xlane.xlu2 %105  ;;  %v160_v55 = vsub.f32 %v948_v40, %v1037_v51 }
 0x114   :  { %v148_v58 = vsub.f32 %v952_v41, %v1039_v54 }
 0x115   :  { %v659_v59 = vpop.eup %658  ;;  %v190_v61 = vmul.f32 1.442695, %v160_v55 }
 0x116   :  { %v661_v62 = vpop.eup %660  ;;  %v166_v63 = vmul.f32 1.442695, %v148_v58  ;;  %v209_v1 = vsel %vm97_vm4, %v659_v59, 0.0 }
 0x117   :  { %662 = vpow2.f32 %v190_v61  ;;  %v224_v7 = vsel %vm97_vm4, %v661_v62, 0.0  ;;  %210 = vadd.xlane.f32.xlu2 %v209_v1  ;;  %v307_v62 = vld [vmem:[%s1172_s2 + $0x8] sm:$0x1]  ;;  %v1093_v1 = vld [vmem:[%s1174_s4] sm:$0xff] }
 0x118   :  { %664 = vpow2.f32 %v166_v63  ;;  %608 = vmatpush.msk.msra.mxu2 %vm356_vm6, %v307_v62  ;;  %609 = vmatpush.msk.msra.mxu3 %vm356_vm6, %v307_v62  ;;  %v306_v63 = vld [vmem:[%s1172_s2] sm:$0xff]  ;;  %s1145_s2 = smov (!%p604_p7), 1  }
 0x119   :  { %225 = vadd.xlane.f32.xlu0 %v224_v7  ;;  %587 = vmatpush.msk.msra.mxu0 %vm356_vm6, %v307_v62 }
 0x11a   :  { %v1049_v8 = vpop.xlane.xlu1 %117  ;;  %607 = vmatpush.msk.msra.mxu1 %vm356_vm6, %v307_v62  ;;  %611 = vmatpush.msra.mxu2 %v306_v63 }
 0x11b   :  { %v1053_v10 = vpop.xlane.xlu2 %132  ;;  %v152_v14 = vsub.f32 %v966_v46, %v1049_v8  ;;  %612 = vmatpush.msra.mxu3 %v306_v63  ;;  %375 = vmatpush.msra.mxu0 %v306_v63 }
 0x11c   :  { %v157_v15 = vsub.f32 %v970_v47, %v1053_v10  ;;  %610 = vmatpush.msra.mxu1 %v306_v63 }
 0x11d   :  { %v663_v16 = vpop.eup %662  ;;  %v174_v17 = vmul.f32 1.442695, %v152_v14 }
 0x11e   :  { %v665_v23 = vpop.eup %664  ;;  %v184_v25 = vmul.f32 1.442695, %v157_v15  ;;  %v236_v26 = vsel %vm97_vm4, %v663_v16, 0.0 }
 0x11f   :  { %666 = vpow2.f32 %v174_v17  ;;  %v200_v27 = vsel %vm97_vm4, %v665_v23, 0.0  ;;  %237 = vadd.xlane.f32.xlu1 %v236_v26 }
 0x120   :  { %668 = vpow2.f32 %v184_v25  ;;  %201 = vadd.xlane.f32.xlu2 %v200_v27 }
 0x121   :  { %670 = vpow2.f32 %v176_v30 }
 0x122   :  { %v1067_v31 = vpop.xlane.xlu1 %144 }
 0x123   :  { %v1069_v32 = vpop.xlane.xlu2 %108  ;;  %v161_v33 = vsub.f32 %v984_v52, %v1067_v31 }
 0x124   :  { %v149_v36 = vsub.f32 %v988_v53, %v1069_v32 }
 0x125   :  { %v667_v39 = vpop.eup %666  ;;  %v192_v42 = vmul.f32 1.442695, %v161_v33 }
 0x126   :  { %v669_v43 = vpop.eup %668  ;;  %v168_v44 = vmul.f32 1.442695, %v149_v36  ;;  %v212_v45 = vsel %vm97_vm4, %v667_v39, 0.0 }
 0x127   :  { %672 = vpow2.f32 %v192_v42  ;;  %v227_v48 = vsel %vm97_vm4, %v669_v43, 0.0  ;;  %213 = vadd.xlane.f32.xlu0 %v212_v45  ;;  %v671_v49 = vpop.eup %670 }
 0x128   :  { %674 = vpow2.f32 %v168_v44  ;;  %228 = vadd.xlane.f32.xlu1 %v227_v48  ;;  %v215_v59 = vsel %vm97_vm4, %v671_v49, 0.0 }
 0x12d   :  { %v673_v50 = vpop.eup %672 }
 0x12e   :  { %v675_v55 = vpop.eup %674  ;;  %v239_v58 = vsel %vm97_vm4, %v673_v50, 0.0 }
 0x12f   :  { %v203_v61 = vsel %vm97_vm4, %v675_v55, 0.0  ;;  %240 = vadd.xlane.f32.xlu2 %v239_v58 }
 0x130   :  { %216 = vadd.xlane.f32.xlu1 %v215_v59  ;;  %204 = vadd.xlane.f32.xlu0 %v203_v61 }
 0x172   :  { %v232_v7 = vpop.xlane.xlu2 %231 }
 0x173   :  { %676 = vlog2.f32 %v232_v7  ;;  %v220_v14 = vpop.xlane.xlu1 %219 }
 0x174   :  { %678 = vlog2.f32 %v220_v14 }
 0x179   :  { %v677_v15 = vpop.eup %676 }
 0x17a   :  { %v679_v16 = vpop.eup %678  ;;  %v267_v17 = vmul.f32 0.6931472, %v677_v15 }
 0x17b   :  { %v259_v23 = vmul.f32 0.6931472, %v679_v16  ;;  %v223_v24 = vpop.xlane.xlu2 %222  ;;  %v208_v25 = vpop.xlane.xlu1 %207 }
 0x17c   :  { %v286_v26 = vadd.f32 %v267_v17, %v994_v56  ;;  %680 = vlog2.f32 %v223_v24  ;;  %v196_v27 = vpop.xlane.xlu0 %195 }
 0x17d   :  { %v282_v30 = vadd.f32 %v259_v23, %v996_v57  ;;  %682 = vlog2.f32 %v196_v27 }
 0x17e   :  { %684 = vlog2.f32 %v208_v25  ;;  %v302_v33 = vsub.f32 %v861_v11, %v286_v26 }
 0x17f   :  { %v298_v36 = vsub.f32 %v865_v12, %v282_v30 }
 0x180   :  { %600 = vmatmul.msk.f32.vlgmr.msra.gmra.mxu3 %vm97_vm4, %v302_v33 }
 0x181   :  { %596 = vmatmul.msk.f32.vlgmr.msra.gmra.mxu2 %vm97_vm4, %v298_v36 }
 0x182   :  { %v681_v39 = vpop.eup %680 }
 0x183   :  { %v683_v42 = vpop.eup %682  ;;  %v261_v43 = vmul.f32 0.6931472, %v681_v39  ;;  %v199_v44 = vpop.xlane.xlu1 %198 }
 0x184   :  { %v685_v45 = vpop.eup %684  ;;  %v243_v56 = vmul.f32 0.6931472, %v683_v42  ;;  %v235_v48 = vpop.xlane.xlu0 %234  ;;  %686 = vlog2.f32 %v199_v44 }
 0x185   :  { %v283_v57 = vadd.f32 %v261_v43, %v1008_v6  ;;  %v251_v49 = vmul.f32 0.6931472, %v685_v45  ;;  %688 = vlog2.f32 %v235_v48 }
 0x186   :  { %v274_v11 = vadd.f32 %v243_v56, %v1006_v4 }
 0x187   :  { %v278_v12 = vadd.f32 %v251_v49, %v1002_v60  ;;  %v299_v50 = vsub.f32 %v896_v22, %v283_v57 }
 0x188   :  { %v290_v55 = vsub.f32 %v892_v21, %v274_v11 }
 0x189   :  { %v294_v58 = vsub.f32 %v869_v13, %v278_v12  ;;  %597 = vmatmul.msk.f32.gmra.mxu2 %vm97_vm4, %v299_v50 }
 0x18a   :  { %v687_v59 = vpop.eup %686  ;;  %588 = vmatmul.msk.f32.vlgmr.msra.gmra.mxu0 %vm97_vm4, %v290_v55  ;;  %v211_v61 = vpop.xlane.xlu2 %210 }
 0x18b   :  { %v689_v62 = vpop.eup %688  ;;  %v245_v6 = vmul.f32 0.6931472, %v687_v59  ;;  %592 = vmatmul.msk.f32.vlgmr.msra.gmra.mxu1 %vm97_vm4, %v294_v58  ;;  %690 = vlog2.f32 %v211_v61 }
 0x18c   :  { %v269_v4 = vmul.f32 0.6931472, %v689_v62  ;;  %v226_v63 = vpop.xlane.xlu0 %225 }
 0x18d   :  { %v275_v60 = vadd.f32 %v245_v6, %v1018_v19  ;;  %692 = vlog2.f32 %v226_v63 }
 0x18e   :  { %v287_v21 = vadd.f32 %v269_v4, %v1016_v18 }
 0x18f   :  { %v291_v13 = vsub.f32 %v916_v29, %v275_v60 }
 0x190   :  { %v303_v22 = vsub.f32 %v912_v28, %v287_v21 }
 0x191   :  { %v691_v7 = vpop.eup %690 }
 0x192   :  { %v253_v14 = vmul.f32 0.6931472, %v691_v7  ;;  %589 = vmatmul.msk.f32.gmra.mxu0 %vm97_vm4, %v291_v13  ;;  %601 = vmatmul.msk.f32.gmra.mxu3 %vm97_vm4, %v303_v22  ;;  %v238_v15 = vpop.xlane.xlu1 %237 }
 0x193   :  { %v693_v16 = vpop.eup %692  ;;  %v202_v17 = vpop.xlane.xlu2 %201  ;;  %694 = vlog2.f32 %v238_v15 }
 0x194   :  { %v263_v23 = vmul.f32 0.6931472, %v693_v16  ;;  %v279_v19 = vadd.f32 %v253_v14, %v1027_v37  ;;  %696 = vlog2.f32 %v202_v17 }
 0x196   :  { %v284_v18 = vadd.f32 %v263_v23, %v1029_v38  ;;  %v295_v29 = vsub.f32 %v930_v34, %v279_v19 }
 0x198   :  { %593 = vmatmul.msk.f32.gmra.mxu1 %vm97_vm4, %v295_v29  ;;  %v300_v28 = vsub.f32 %v934_v35, %v284_v18 }
 0x199   :  { %v695_v24 = vpop.eup %694 }
 0x19a   :  { %v697_v25 = vpop.eup %696  ;;  %v271_v26 = vmul.f32 0.6931472, %v695_v24  ;;  %598 = vmatmul.msk.f32.gmra.mxu2 %vm97_vm4, %v300_v28  ;;  %v214_v27 = vpop.xlane.xlu0 %213 }
 0x19b   :  { %v247_v30 = vmul.f32 0.6931472, %v697_v25  ;;  %698 = vlog2.f32 %v214_v27  ;;  %v229_v33 = vpop.xlane.xlu1 %228 }
 0x19c   :  { %v288_v37 = vadd.f32 %v271_v26, %v1037_v51  ;;  %700 = vlog2.f32 %v229_v33 }
 0x19d   :  { %v276_v38 = vadd.f32 %v247_v30, %v1039_v54 }
 0x19e   :  { %v304_v34 = vsub.f32 %v948_v40, %v288_v37 }
 0x19f   :  { %v292_v36 = vsub.f32 %v952_v41, %v276_v38 }
 0x1a0   :  { %602 = vmatmul.msk.f32.gmra.mxu3 %vm97_vm4, %v304_v34 }
 0x1a1   :  { %v699_v35 = vpop.eup %698  ;;  %590 = vmatmul.msk.f32.gmra.mxu0 %vm97_vm4, %v292_v36 }
 0x1a2   :  { %v701_v39 = vpop.eup %700  ;;  %v255_v42 = vmul.f32 0.6931472, %v699_v35  ;;  %v241_v43 = vpop.xlane.xlu2 %240 }
 0x1a3   :  { %v265_v44 = vmul.f32 0.6931472, %v701_v39  ;;  %v205_v45 = vpop.xlane.xlu0 %204  ;;  %702 = vlog2.f32 %v241_v43  ;;  %v217_v56 = vpop.xlane.xlu1 %216 }
 0x1a4   :  { %v280_v51 = vadd.f32 %v255_v42, %v1049_v8  ;;  %704 = vlog2.f32 %v205_v45 }
 0x1a5   :  { %v285_v54 = vadd.f32 %v265_v44, %v1053_v10  ;;  %706 = vlog2.f32 %v217_v56 }
 0x1a6   :  { %v296_v40 = vsub.f32 %v966_v46, %v280_v51 }
 0x1a7   :  { %v301_v41 = vsub.f32 %v970_v47, %v285_v54 }
 0x1a8   :  { %594 = vmatmul.msk.f32.gmra.mxu1 %vm97_vm4, %v296_v40 }
 0x1a9   :  { %v703_v48 = vpop.eup %702  ;;  %599 = vmatmul.msk.f32.gmra.mxu2 %vm97_vm4, %v301_v41 }
 0x1aa   :  { %v705_v57 = vpop.eup %704  ;;  %v273_v49 = vmul.f32 0.6931472, %v703_v48 }
 0x1ab   :  { %v707_v11 = vpop.eup %706  ;;  %v249_v12 = vmul.f32 0.6931472, %v705_v57 }
 0x1ac   :  { %v289_v50 = vadd.f32 %v273_v49, %v1067_v31  ;;  %v257_v8 = vmul.f32 0.6931472, %v707_v11 }
 0x1ad   :  { %v277_v55 = vadd.f32 %v249_v12, %v1069_v32 }
 0x1ae   :  { %v281_v10 = vadd.f32 %v257_v8, %v1051_v9  ;;  %v305_v46 = vsub.f32 %v984_v52, %v289_v50 }
 0x1af   :  { %v293_v47 = vsub.f32 %v988_v53, %v277_v55 }
 0x1b0   :  { %v297_v58 = vsub.f32 %v888_v20, %v281_v10  ;;  %603 = vmatmul.msk.f32.gmra.mxu3 %vm97_vm4, %v305_v46 }
 0x1b1   :  { %591 = vmatmul.msk.f32.gmra.mxu0 %vm97_vm4, %v293_v47 }
 0x1b2   :  { %595 = vmatmul.msk.f32.gmra.mxu1 %vm97_vm4, %v297_v58 }
 0x203   :  { %v413_v59 = vpop.f32.mrf.mxu3 }
 0x204   :  { %v401_v61 = vpop.f32.mrf.mxu2  ;;  %437 = vst [vmem:[#allocation2 + $0x60] sm:$0xff] %v413_v59 }
 0x205   :  { %433 = vst [vmem:[#allocation2 + $0x40] sm:$0xff] %v401_v61 }
 0x207   :  { %v377_v31 = vpop.f32.mrf.mxu0 }
 0x208   :  { %425 = vst [vmem:[#allocation2] sm:$0xff] %v377_v31  ;;  %v461_v9 = vsel %vm457_vm7, %v377_v31, -1e+30   ;;  %v389_v52 = vpop.f32.mrf.mxu1 }
 0x209   :  { %429 = vst [vmem:[#allocation2 + $0x20] sm:$0xff] %v389_v52  ;;  %v786_v14 = vmov %v461_v9  }
 0x20c   :  { %v404_v53 = vpop.f32.mrf.mxu2 }
 0x20d   :  { %434 = vst [vmem:[#allocation2 + $0x48] sm:$0xff] %v404_v53 }
 0x20f   :  { %v380_v20 = vpop.f32.mrf.mxu0 }
 0x210   :  { %426 = vst [vmem:[#allocation2 + $0x8] sm:$0xff] %v380_v20 }
 0x215   :  { %v416_v32 = vpop.f32.mrf.mxu3  ;;  %v392_v62 = vpop.f32.mrf.mxu1 }
 0x216   :  { %438 = vst [vmem:[#allocation2 + $0x68] sm:$0xff] %v416_v32 }
 0x217   :  { %430 = vst [vmem:[#allocation2 + $0x28] sm:$0xff] %v392_v62 }
 0x21d   :  { %v407_v6 = vpop.f32.mrf.mxu2 }
 0x21e   :  { %435 = vst [vmem:[#allocation2 + $0x50] sm:$0xff] %v407_v6  ;;  %v383_v4 = vpop.f32.mrf.mxu0 }
 0x21f   :  { %427 = vst [vmem:[#allocation2 + $0x10] sm:$0xff] %v383_v4 }
 0x223   :  { %v419_v63 = vpop.f32.mrf.mxu3 }
 0x224   :  { %439 = vst [vmem:[#allocation2 + $0x70] sm:$0xff] %v419_v63 }
 0x225   :  { %v395_v60 = vpop.f32.mrf.mxu1 }
 0x226   :  { %431 = vst [vmem:[#allocation2 + $0x30] sm:$0xff] %v395_v60 }
 0x22c   :  { %v410_v21 = vpop.f32.mrf.mxu2 }
 0x22d   :  { %436 = vst [vmem:[#allocation2 + $0x58] sm:$0xff] %v410_v21 }
 0x22e   :  { %v386_v13 = vpop.f32.mrf.mxu0 }
 0x22f   :  { %428 = vst [vmem:[#allocation2 + $0x18] sm:$0xff] %v386_v13  ;;  %v398_v22 = vpop.f32.mrf.mxu1 }
 0x230   :  { %432 = vst [vmem:[#allocation2 + $0x38] sm:$0xff] %v398_v22  ;;  %575 = sbr.rel (%p604_p7) target bundleno = 725 (0x2d5), region = 38 }
 0x233   :  { %v422_v7 = vpop.f32.mrf.mxu3 }
 0x234   :  { %440 = vst [vmem:[#allocation2 + $0x78] sm:$0xff] %v422_v7 }
 0x235   :  { %v778_v15 = vmov %v461_v9  }
 0x236 LB: > { %v792_v16 = vmov 0   ;;  %s793_s4 = smov 1   ;;  %v499_v17 = vstv %s784_s2  ;;  %s794_s15 = smov 2   ;;  %s784_s2 = sphi %s1145_s2, %s465_s2   ;;  %v780_v15 = vphi %v778_v15, %v779_v15  }
 0x237   : > { %708 = vset.pattern.permute.xlu1 %v792_v16  ;;  %709 = vset.pattern.permute.xlu0 %v792_v16  ;;  %vm500_vm8 = vcmp.lt.s32.totalorder %v499_v17, %v1093_v1  ;;  %s605_s16 = sshll.u32 %s784_s2, 3  ;;  %s465_s2 = sadd.s32 1, %s784_s2  }
 0x238   : > { %472 = vrot.lane.b32.xlu0 %v780_v15, %s793_s4  ;;  %v501_v23 = vsel %vm500_vm8, 1, %v792_v16  ;;  %s470_s17 = scalar_lea.vmem [#allocation2], %s605_s16  ;;  %p464_p8 = scmp.ge.s32.totalorder %s465_s2, %s1193_s1 }
 0x239   : > { %503 = vperm.xlu1 %708, %v501_v23  }
 0x23b   : > { %v471_v56 = vld [vmem:[%s470_s17] sm:$0xff] }
 0x240   : > { %477 = vrot.lane.b32.xlu0 %v780_v15, %s794_s15 }
 0x2aa   : > { %v473_v19 = vpop.permute.xlu0 %472 }
 0x2ab   : > { %v476_v18 = vsel %vm441_vm0, %v473_v19, -1e+30  ;;  %v504_v44 = vpop.permute.xlu1 %503 }
 0x2ac   : > { %v482_v29 = vmax.f32 %v780_v15, %v476_v18  ;;  %vm505_vm9 = vcmp.eq.s32.totalorder %v504_v44, 1 }
 0x2b2   : > { %v478_v28 = vpop.permute.xlu0 %477 }
 0x2b3   : > { %v481_v24 = vsel %vm841_vm3, %v478_v28, -1e+30 }
 0x2b4   : > { %v483_v25 = vmax.f32 %v482_v29, %v481_v24 }
 0x2b6   : > { %v484_v26 = vsub.f32 %v780_v15, %v483_v25  ;;  %v487_v27 = vsub.f32 %v476_v18, %v483_v25  ;;  %v491_v30 = vsub.f32 %v481_v24, %v483_v25 }
 0x2b8   : > { %v485_v33 = vmul.f32 1.442695, %v484_v26  ;;  %v488_v37 = vmul.f32 1.442695, %v487_v27  ;;  %v492_v38 = vmul.f32 1.442695, %v491_v30 }
 0x2ba   : > { %710 = vpow2.f32 %v485_v33 }
 0x2bb   : > { %712 = vpow2.f32 %v488_v37 }
 0x2bc   : > { %714 = vpow2.f32 %v492_v38 }
 0x2c0   : > { %v711_v34 = vpop.eup %710 }
 0x2c1   : > { %v713_v36 = vpop.eup %712 }
 0x2c2   : > { %v490_v35 = vadd.f32 %v713_v36, %v711_v34  ;;  %v715_v39 = vpop.eup %714 }
 0x2c4   : > { %v494_v42 = vadd.f32 %v715_v39, %v490_v35 }
 0x2c6   : > { %716 = vlog2.f32 %v494_v42 }
 0x2cc   : > { %v717_v43 = vpop.eup %716 }
 0x2cd   : > { %v496_v45 = vmul.f32 0.6931472, %v717_v43 }
 0x2cf   : > { %v497_v51 = vadd.f32 %v496_v45, %v483_v25 }
 0x2d0   :  { %467 = sbr.rel (!%p464_p8) target bundleno = 566 (0x236), region = 44 }
 0x2d1   : > { %v498_v54 = vadd.f32 %v497_v51, %v471_v56 }
 0x2d3   : > { %v506_v40 = vsel %vm505_vm9, %v498_v54, %v780_v15  }
 0x2d4   : > { %v779_v15 = vmov %v506_v40   ;;  %v787_v14 = vmov (%p464_p8), %v506_v40  }
 0x2d5 PF:  { %718 = vset.pattern.permute.xlu0 %v791_v2  ;;  %v507_v41 = vmul.u32 2, %v832_v0  ;;  %719 = vset.pattern.permute.xlu2 %v791_v2  ;;  %v530_v2 = vcvt.s32.f32 %v832_v0  ;;  %s795_s18 = smov [#allocation5]   ;;  %s561_s22 = sshll.u32 %s1175_s5, 4  ;;  %v788_v14 = vphi %v786_v14, %v787_v14   ;;  %s562_s22 = int_to_ptr.hbm [resolvable:$true] %s561_s22 }
 0x2d6   :  { %s559_s19 = sshll.u32 %s795_s18, 4  ;;  %s560_s19 = int_to_ptr.vmem [resolvable:$true] %s559_s19 }
 0x2d7   :  { %509 = vperm.xlu0 %718, %v507_v41   ;;  %v606_v48 = vadd.s32 4294967295, %v507_v41  ;;  %vm536_vm13 = vweird.f32 %v530_v2  ;;  %v540_v59 = vand.u32 2147483647, %v530_v2 }
 0x2d9   :  { %vm541_vm0 = vcmp.eq.f32.partialorder %v540_v59, 8.507059e+37 }
 0x2df   :  { %514 = vperm.xlu0 %718, %v606_v48  }
 0x349   :  { %v510_v57 = vpop.permute.xlu0 %509 }
 0x34a   :  { %vm511_vm10 = vcmp.eq.s32.totalorder %v836_v3, %v510_v57 }
 0x351   :  { %v515_v49 = vpop.permute.xlu0 %514 }
 0x352   :  { %vm516_vm11 = vcmp.eq.s32.totalorder %v836_v3, %v515_v49  ;;  %v542_v3 = vand.u32 2147483648, %v530_v2 }
 0x353   :  { %vm517_vm12 = vmor %vm511_vm10, %vm516_vm11 }
 0x354   :  { %v518_v5 = vsel %vm517_vm12, %v788_v14, -1e+30  ;;  %v543_v31 = vor.u32 1.1754944e-38, %v542_v3 }
 0x355   :  { %519 = vmax.xlane.f32.xlu1 %v518_v5 }
 0x3c8   :  { %v520_v1 = vpop.xlane.xlu1 %519 }
 0x3c9   :  { %v521_v11 = vsub.f32 %v518_v5, %v520_v1 }
 0x3cb   :  { %v522_v12 = vmul.f32 1.442695, %v521_v11 }
 0x3cd   :  { %720 = vpow2.f32 %v522_v12 }
 0x3ce   :  { %722 = vrcp.f32 %v530_v2 }
 0x3d3   :  { %v721_v50 = vpop.eup %720 }
 0x3d4   :  { %524 = vadd.xlane.f32.xlu1 %v721_v50  ;;  %v723_v8 = vpop.eup %722 }
 0x3d5   :  { %v532_v55 = vmul.f32 %v723_v8, %v530_v2  ;;  %vm537_vm14 = vweird.f32 %v723_v8 }
 0x3d6   :  { %vm538_vm15 = vmor %vm536_vm13, %vm537_vm14 }
 0x3d7   :  { %v533_v10 = vsub.f32 1.0, %v532_v55 }
 0x3d9   :  { %v534_v47 = vmul.f32 %v723_v8, %v533_v10 }
 0x3db   :  { %v535_v58 = vadd.f32 %v723_v8, %v534_v47 }
 0x3dd   :  { %v539_v52 = vsel %vm538_vm15, %v723_v8, %v535_v58 }
 0x3de   :  { %v544_v0 = vsel %vm541_vm0, %v543_v31, %v539_v52 }
 0x447   :  { %v525_v46 = vpop.xlane.xlu1 %524 }
 0x448   :  { %724 = vlog2.f32 %v525_v46 }
 0x44e   :  { %v725_v61 = vpop.eup %724 }
 0x44f   :  { %v527_v9 = vmul.f32 0.6931472, %v725_v61 }
 0x451   :  { %v528_v53 = vadd.f32 %v527_v9, %v520_v1 }
 0x453   :  { %v529_v20 = vsub.f32 0.0, %v528_v53 }
 0x455   :  { %v545_v32 = vmul.f32 %v544_v0, %v529_v20 }
 0x457   :  { %vm546_vm1 = vcmp.lt.f32.partialorder %v545_v32, 1e+20 }
 0x458   :  { %v547_v62 = vsel %vm546_vm1, %v545_v32, 0.0 }
 0x459   :  { %550 = vperm.xlu2 %719, %v547_v62  }
 0x4b3   :  { %v551_v6 = vpop.permute.xlu2 %550 }
 0x4b4   :  { %553 = vst [vmem:[#allocation5] sm:$0xff] %v551_v6 }
 0x4b5   :  { %564 = dma.vmem_to_hbm [thread:$0]  %s560_s19, 128, %s562_s22, [#allocation6]  }
 0x4b6   :  { %776 = dma.done.wait [#allocation6], 128  }
 0x4b7   :  { %777 = vsyncadd [#allocation6], 4294967168 }
 0x4b8   :  { %569 = vsyncpa [#allocation6], 1 }

</bundles_post_ra>
